<compile_context>
chip_gen: v5e
topology: v5e:2x2
jax: 0.10.0
libtpu: 0.0.40
codegen_flags: <defaults>
</compile_context>

<pallas_src>
import functools
import math

import jax
import jax.numpy as jnp
from jax.experimental import pallas as pl
from jax.experimental.pallas import tpu as pltpu


# ----------------------------------------------------------------------------
# matmul + bias + LeakyReLU kernel (im2col conv hot path + fc layer)
# ----------------------------------------------------------------------------
def _matmul_bias_act_kernel(x_ref, w_ref, b_ref, o_ref, *, alpha):
    # Activation cast to bf16 happens in-kernel (no XLA convert / extra HBM copy).
    y = jnp.dot(x_ref[...].astype(jnp.bfloat16), w_ref[...],
                preferred_element_type=jnp.float32)
    y = y + b_ref[...]
    if alpha is not None:
        y = jnp.where(y >= 0.0, y, alpha * y)
    o_ref[...] = y


def _pack_linear(w, b):
    """Pre-pack a linear layer once: pad N to a lane-dense multiple of 128,
    cast the weight to bf16 (f32 accumulation in-kernel)."""
    K, N = w.shape
    n_pad = (-N) % 128
    return {
        "w": jnp.pad(w, ((0, 0), (0, n_pad))).astype(jnp.bfloat16),   # (K, Np)
        "b": jnp.pad(b, (0, n_pad)).reshape(1, N + n_pad).astype(jnp.float32),
        "n": N,
    }


def matmul_bias_act(x, packed, alpha=None, tm=512):
    """act(x @ w + b) with pre-packed (padded bf16) weights.  x:(M,K) f32."""
    wp, bp, N = packed["w"], packed["b"], packed["n"]
    M, K = x.shape
    Np = wp.shape[1]
    if M <= tm:
        tm_eff, xp = M, x
    else:
        tm_eff = tm
        xp = jnp.pad(x, ((0, (-M) % tm), (0, 0)))
    Mp = xp.shape[0]

    flops = 2 * Mp * K * Np
    bytes_accessed = 4 * Mp * K + 2 * K * Np + 4 * Np + 4 * Mp * Np

    out = pl.pallas_call(
        functools.partial(_matmul_bias_act_kernel, alpha=alpha),
        out_shape=jax.ShapeDtypeStruct((Mp, Np), jnp.float32),
        grid=(Mp // tm_eff,),
        in_specs=[
            pl.BlockSpec((tm_eff, K), lambda i: (i, 0)),
            pl.BlockSpec((K, Np), lambda i: (0, 0)),      # weights stay resident
            pl.BlockSpec((1, Np), lambda i: (0, 0)),
        ],
        out_specs=pl.BlockSpec((tm_eff, Np), lambda i: (i, 0)),
        compiler_params=pltpu.CompilerParams(dimension_semantics=("parallel",)),
        cost_estimate=pl.CostEstimate(flops=int(flops), transcendentals=0,
                                      bytes_accessed=int(bytes_accessed)),
    )(xp, wp, bp)
    if Mp == M and Np == N:
        return out
    return out[:M, :N]


# ----------------------------------------------------------------------------
# In-kernel warp helpers (NCHW layout, separable gather)
# ----------------------------------------------------------------------------
def _strip_coords(base, H, W, TS):
    """Flat strip pixel indices -> integer + float (row, col) coordinates."""
    p_int = base + jax.lax.broadcasted_iota(jnp.int32, (1, TS), 1)
    if (W & (W - 1)) == 0:                         # power-of-two width: shift/mask
        shift = W.bit_length() - 1
        ii_i = p_int >> shift
        jj_i = p_int & (W - 1)
    else:
        ii_i = p_int // W
        jj_i = p_int - ii_i * W
    return ii_i.astype(jnp.float32), jj_i.astype(jnp.float32), ii_i, jj_i


def _separable_gather(img, gw_h, gw_w, C, H):
    """out[c,p] = sum_{h,w} img[c,h,w] * gw_h[h,p] * gw_w[w,p].

    img: (C, H, W) f32; gw_h: (H, TS); gw_w: (W, TS).  Stage A is one MXU dot
    contracting W; stage B is a broadcast multiply + one sublane reduction.
    """
    TS = gw_h.shape[1]
    W = img.shape[2]
    a = jnp.dot(img.reshape(C * H, W), gw_w,
                preferred_element_type=jnp.float32)          # (C*H, TS)
    a = a.reshape(C, H, TS)
    return jnp.sum(a * gw_h[None, :, :], axis=1)             # (C, TS)


def _bilinear_sample(img, dy, dx, ii_f, jj_f, H, W, C):
    """Bilinear sample img (C,H,W) at (i + dy, j + dx), border (clamp) padding.

    Tent weights relu(1 - |iota - s|) replace the int y0/y1/x0/x1 path; the
    clamped coordinate makes border taps merge to weight 1.
    """
    sy = jnp.clip(ii_f + dy, 0.0, H - 1.0)                    # (1, TS)
    sx = jnp.clip(jj_f + dx, 0.0, W - 1.0)
    hiota = jax.lax.broadcasted_iota(jnp.float32, (H, sy.shape[1]), 0)
    wiota = jax.lax.broadcasted_iota(jnp.float32, (W, sx.shape[1]), 0)
    gw_h = jnp.maximum(0.0, 1.0 - jnp.abs(hiota - sy))        # (H, TS)
    gw_w = jnp.maximum(0.0, 1.0 - jnp.abs(wiota - sx))        # (W, TS)
    return _separable_gather(img, gw_h, gw_w, C, H)


def _nearest_upsample(coarse, ii_i, jj_i, Hc, Wc, up_h, up_w):
    """Nearest-neighbour sample of the coarse flow at (i // up_h, j // up_w)."""
    TS = ii_i.shape[1]
    ic = ii_i // up_h
    jc = jj_i // up_w
    gw_h = (jax.lax.broadcasted_iota(jnp.int32, (Hc, TS), 0) == ic
            ).astype(jnp.float32)
    gw_w = (jax.lax.broadcasted_iota(jnp.int32, (Wc, TS), 0) == jc
            ).astype(jnp.float32)
    return _separable_gather(coarse, gw_h, gw_w, 2, Hc)       # (2, TS)


def _pick_ts(hw, h, w, c):
    """Largest lane-dense strip that fits a conservative (v7x-safe) VMEM budget."""
    if hw <= 2048:
        return hw
    budget_bytes = 6 * 1024 * 1024
    per_elem = 4 * (3 * h + 2 * w + (c + 2) * h + 8)
    cap = max(128, budget_bytes // max(per_elem, 1))
    ts = min((cap // 128) * 128, (hw // 128) * 128)
    while ts >= 128:
        if hw % ts == 0:
            return ts
        ts -= 128
    # TODO(synk): hw with no multiple-of-128 divisor falls back to one strip.
    return hw


# ----------------------------------------------------------------------------
# Fused kernel 1: affine flow (VPU FMAs, theta from SMEM) + first warp
# ----------------------------------------------------------------------------
def _affine_warp_kernel(theta_ref, mov_ref, flow_ref, warped_ref, *, H, W, C, TS):
    b = pl.program_id(0)
    base = pl.program_id(1) * TS
    ii_f, jj_f, _, _ = _strip_coords(base, H, W, TS)

    yc = ii_f - (H - 1) / 2.0                                  # pixel-centered
    xc = jj_f - (W - 1) / 2.0
    fy = theta_ref[b, 0] * yc + theta_ref[b, 1] * xc + theta_ref[b, 2]
    fx = theta_ref[b, 3] * yc + theta_ref[b, 4] * xc + theta_ref[b, 5]

    flow_ref[0] = jnp.concatenate([fy, fx], axis=0)            # (2, TS)
    warped_ref[0] = _bilinear_sample(mov_ref[0], fy, fx, ii_f, jj_f, H, W, C)


def affine_warp(theta6, moving, H, W):
    """theta6 (B,6), moving (B,C,H,W) -> (flow (B,2,HW), warped (B,C,HW))."""
    B, C = moving.shape[0], moving.shape[1]
    HW = H * W
    TS = _pick_ts(HW, H, W, C)
    S = HW // TS
    kernel = functools.partial(_affine_warp_kernel, H=H, W=W, C=C, TS=TS)

    flops = B * HW * (2 * C * H * W + 6 * (H + W) + 12)
    bytes_accessed = 4 * (B * C * H * W + B * (2 + C) * HW + B * 6)

    return pl.pallas_call(
        kernel,
        out_shape=(jax.ShapeDtypeStruct((B, 2, HW), jnp.float32),
                   jax.ShapeDtypeStruct((B, C, HW), jnp.float32)),
        grid=(B, S),
        in_specs=[
            pl.BlockSpec(memory_space=pltpu.MemorySpace.SMEM),     # theta scalars
            pl.BlockSpec((1, C, H, W), lambda b, s: (b, 0, 0, 0)),
        ],
        out_specs=(pl.BlockSpec((1, 2, TS), lambda b, s: (b, 0, s)),
                   pl.BlockSpec((1, C, TS), lambda b, s: (b, 0, s))),
        compiler_params=pltpu.CompilerParams(
            dimension_semantics=("parallel", "parallel")),
        cost_estimate=pl.CostEstimate(flops=int(flops), transcendentals=0,
                                      bytes_accessed=int(bytes_accessed)),
    )(theta6.astype(jnp.float32), moving.astype(jnp.float32))


# ----------------------------------------------------------------------------
# Fused kernel 2: one cascade composition step
#   flow  = nearest_upsample(coarse_flow) * flow_mult          (fused in-kernel)
#   ddf'  = warp(ddf, flow) + flow
#   warped = warp(moving, ddf')
# All image operands stay in NCHW layout -> no inter-cascade HBM transposes.
# ----------------------------------------------------------------------------
def _cascade_step_kernel(mov_ref, ddf_ref, cf_ref, flow_out_ref, ddf_out_ref,
                         warped_ref, *, H, W, C, Hc, Wc, TS, flow_mult):
    base = pl.program_id(1) * TS
    ii_f, jj_f, ii_i, jj_i = _strip_coords(base, H, W, TS)

    flow = _nearest_upsample(cf_ref[0], ii_i, jj_i, Hc, Wc, H // Hc, W // Wc)
    flow = flow * flow_mult                                    # (2, TS)
    flow_out_ref[0] = flow

    ddf_s = _bilinear_sample(ddf_ref[0], flow[0:1, :], flow[1:2, :],
                             ii_f, jj_f, H, W, 2)
    ddf_new = ddf_s + flow
    ddf_out_ref[0] = ddf_new

    warped_ref[0] = _bilinear_sample(mov_ref[0], ddf_new[0:1, :],
                                     ddf_new[1:2, :], ii_f, jj_f, H, W, C)


def cascade_step(moving, ddf_prev, coarse_flow, H, W, flow_mult):
    """moving (B,C,H,W), ddf_prev (B,2,H,W), coarse_flow (B,2,Hc,Wc)
    -> (fine_flow (B,2,HW), ddf_new (B,2,HW), warped (B,C,HW))."""
    B, C = moving.shape[0], moving.shape[1]
    Hc, Wc = coarse_flow.shape[2], coarse_flow.shape[3]
    HW = H * W
    TS = _pick_ts(HW, H, W, C)
    S = HW // TS
    kernel = functools.partial(_cascade_step_kernel, H=H, W=W, C=C,
                               Hc=Hc, Wc=Wc, TS=TS, flow_mult=flow_mult)

    flops = B * HW * (4 * Hc * Wc + (4 + 2 * C) * H * W
                      + 12 * (H + W) + 4 * (Hc + Wc) + 16)
    bytes_accessed = 4 * (B * C * H * W + 2 * B * H * W + 2 * B * Hc * Wc
                          + B * (4 + C) * HW)

    return pl.pallas_call(
        kernel,
        out_shape=(jax.ShapeDtypeStruct((B, 2, HW), jnp.float32),
                   jax.ShapeDtypeStruct((B, 2, HW), jnp.float32),
                   jax.ShapeDtypeStruct((B, C, HW), jnp.float32)),
        grid=(B, S),
        in_specs=[
            pl.BlockSpec((1, C, H, W), lambda b, s: (b, 0, 0, 0)),
            pl.BlockSpec((1, 2, H, W), lambda b, s: (b, 0, 0, 0)),
            pl.BlockSpec((1, 2, Hc, Wc), lambda b, s: (b, 0, 0, 0)),
        ],
        out_specs=(pl.BlockSpec((1, 2, TS), lambda b, s: (b, 0, s)),
                   pl.BlockSpec((1, 2, TS), lambda b, s: (b, 0, s)),
                   pl.BlockSpec((1, C, TS), lambda b, s: (b, 0, s))),
        compiler_params=pltpu.CompilerParams(
            dimension_semantics=("parallel", "parallel")),
        cost_estimate=pl.CostEstimate(flops=int(flops), transcendentals=0,
                                      bytes_accessed=int(bytes_accessed)),
    )(moving.astype(jnp.float32), ddf_prev.astype(jnp.float32),
      coarse_flow.astype(jnp.float32))


# ----------------------------------------------------------------------------
# JAX glue: im2col convolution wrapper (matmul runs in the Pallas kernel)
# TODO(synk): fuse the whole conv stack (halo tiles + 9 shifted dots) into a
#             single pallas_call to avoid the im2col HBM expansion / launches.
# ----------------------------------------------------------------------------
def _im2col_nchw(x, kh, kw, stride, pad):
    xh = jnp.transpose(x, (0, 2, 3, 1))                      # NCHW -> NHWC
    xh = jnp.pad(xh, ((0, 0), (pad, pad), (pad, pad), (0, 0)))
    B, Hp, Wp, C = xh.shape
    Ho = (Hp - kh) // stride + 1
    Wo = (Wp - kw) // stride + 1
    cols = []
    for i in range(kh):
        for j in range(kw):
            cols.append(xh[:, i:i + stride * Ho:stride, j:j + stride * Wo:stride, :])
    cols = jnp.concatenate(cols, axis=-1)                    # (B, Ho, Wo, kh*kw*C)
    return cols.reshape(B * Ho * Wo, kh * kw * C), Ho, Wo


def conv2d(x, layer, stride=1, pad=1, alpha=0.1):
    """3x3 conv, NCHW in/out. layer: pre-packed linear (9*Cin -> Cout)."""
    B = x.shape[0]
    cols, Ho, Wo = _im2col_nchw(x, 3, 3, stride, pad)
    y = matmul_bias_act(cols, layer, alpha=alpha)            # (B*Ho*Wo, Cout)
    y = y.reshape(B, Ho, Wo, layer["n"])
    return jnp.transpose(y, (0, 3, 1, 2))


# ----------------------------------------------------------------------------
# Sub-networks (scaled-down VTNAffineStem / VTN; spatial collapse assumes 16x16)
# ----------------------------------------------------------------------------
def affine_stem_theta(p, fixed, moving):
    B = fixed.shape[0]
    x = jnp.concatenate([fixed, moving], axis=1)              # (B, 2, H, W)
    h = conv2d(x, p["c1"], stride=2, alpha=0.1)                # (B,16,H/2,W/2)
    h = conv2d(h, p["c2"], stride=2, alpha=0.1)                # (B,32,H/4,W/4)
    h = conv2d(h, p["c3"], stride=2, alpha=0.1)                # (B,64,H/8,W/8)
    h = conv2d(h, p["c4"], stride=2, alpha=0.1)                # (B,64,1,1) @16x16
    h = h.reshape(B, -1)                                       # (B, 64)
    return matmul_bias_act(h, p["fc"], alpha=None)             # (B, 6)


def vtn_forward(p, fixed, moving):
    """Returns the coarse flow (B,2,H/4,W/4); upsample + flow multiplier are
    fused into the cascade_step kernel."""
    x = jnp.concatenate([fixed, moving], axis=1)               # (B, 2, H, W)
    h = conv2d(x, p["c1"], stride=2, alpha=0.1)                 # (B,16,H/2,W/2)
    h = conv2d(h, p["c2"], stride=2, alpha=0.1)                 # (B,32,H/4,W/4)
    # TODO(synk): VTN's transposed-conv decoder with skip connections is
    # approximated by nearest-neighbour upsampling of this coarse flow.
    return conv2d(h, p["pr"], stride=1, alpha=None)             # (B, 2,H/4,W/4)


def recursive_cascade_forward(params, fixed, moving, n_cascades):
    B, C, H, W = moving.shape

    theta = affine_stem_theta(params["affine"], fixed, moving)   # (B, 6)
    flow0_flat, warped0_flat = affine_warp(theta, moving, H, W)  # fused flow+warp

    flows = [flow0_flat.reshape(B, 2, H, W)]
    stem_results = [warped0_flat.reshape(B, C, H, W)]
    ddf = flows[0]                                               # (B, 2, H, W)

    for p in params["cascades"]:
        coarse = vtn_forward(p, fixed, stem_results[-1])         # (B,2,H/4,W/4)
        flow_flat, ddf_flat, warped_flat = cascade_step(
            moving, ddf, coarse, H, W, flow_mult=1.0 / n_cascades)
        ddf = ddf_flat.reshape(B, 2, H, W)
        stem_results.append(warped_flat.reshape(B, C, H, W))
        flows.append(flow_flat.reshape(B, 2, H, W))

    return stem_results, flows, ddf


# ----------------------------------------------------------------------------
# Deterministic parameter init (weights pre-packed for the matmul kernel)
# ----------------------------------------------------------------------------
def _conv_params(key, cin, cout, scale=1.0):
    fan_in = 9 * cin
    w = (scale / math.sqrt(fan_in)) * jax.random.normal(
        key, (fan_in, cout), jnp.float32)
    b = jnp.zeros((cout,), jnp.float32)
    return _pack_linear(w, b)


def init_params(key, n_cascades):
    keys = jax.random.split(key, 6 + 3 * n_cascades)
    affine = {
        "c1": _conv_params(keys[0], 2, 16),
        "c2": _conv_params(keys[1], 16, 32),
        "c3": _conv_params(keys[2], 32, 64),
        "c4": _conv_params(keys[3], 64, 64),
        "fc": _pack_linear(
            0.01 * jax.random.normal(keys[4], (64, 6), jnp.float32),
            jnp.zeros((6,), jnp.float32)),
    }
    cascades = []
    for i in range(n_cascades):
        cascades.append({
            "c1": _conv_params(keys[5 + 3 * i], 2, 16),
            "c2": _conv_params(keys[6 + 3 * i], 16, 32),
            "pr": _conv_params(keys[7 + 3 * i], 32, 2, scale=0.1),
        })
    return {"affine": affine, "cascades": cascades}


# ----------------------------------------------------------------------------
if __name__ == "__main__":
    key = jax.random.PRNGKey(0)
    k_fixed, k_moving, k_params = jax.random.split(key, 3)

    B, H, W = 2, 16, 16
    n_cascades = 2

    fixed = jax.random.uniform(k_fixed, (B, 1, H, W), jnp.float32)
    moving = jax.random.uniform(k_moving, (B, 1, H, W), jnp.float32)
    params = init_params(k_params, n_cascades)

    stem_results, flows, ddf = recursive_cascade_forward(
        params, fixed, moving, n_cascades
    )

    for t in stem_results + flows + [ddf]:
        jax.block_until_ready(t)

    assert ddf.shape == (B, 2, H, W)
    assert len(stem_results) == n_cascades + 1
    assert all(s.shape == (B, 1, H, W) for s in stem_results)
    assert all(f.shape == (B, 2, H, W) for f in flows)
    assert all(bool(jnp.all(jnp.isfinite(t))) for t in stem_results + flows + [ddf])
    print("KERNEL_OK")
</pallas_src>

<mosaic_0001>
module attributes {stable_mosaic.version = 11 : i64} {
  func.func @_matmul_bias_act_kernel(%arg0: i32, %arg1: memref<128x18xf32, #tpu.memory_space<vmem>>, %arg2: memref<18x128xbf16, #tpu.memory_space<vmem>>, %arg3: memref<1x128xf32, #tpu.memory_space<vmem>>, %arg4: memref<128x128xf32, #tpu.memory_space<vmem>>) attributes {dimension_semantics = [#tpu.dimension_semantics<parallel>], iteration_bounds = array<i64: 1>, scalar_prefetch = 0 : i64, scratch_operands = 0 : i64, tpu.core_type = #tpu.core_type<tc>, window_params = [{transform_indices = @transform_0, window_bounds = array<i64: 128, 18>}, {pipeline_mode = #tpu.pipeline_mode<synchronous>, transform_indices = @transform_1, window_bounds = array<i64: 18, 128>}, {pipeline_mode = #tpu.pipeline_mode<synchronous>, transform_indices = @transform_2, window_bounds = array<i64: 1, 128>}, {transform_indices = @transform_3, window_bounds = array<i64: 128, 128>}]} {
    %c0 = arith.constant 0 : index
    %c0_0 = arith.constant 0 : index
    %0 = vector.load %arg1[%c0, %c0_0] : memref<128x18xf32, #tpu.memory_space<vmem>>, vector<128x18xf32>
    %1 = arith.truncf %0 : vector<128x18xf32> to vector<128x18xbf16>
    %c0_1 = arith.constant 0 : index
    %c0_2 = arith.constant 0 : index
    %2 = vector.load %arg2[%c0_1, %c0_2] : memref<18x128xbf16, #tpu.memory_space<vmem>>, vector<18x128xbf16>
    %cst = arith.constant dense<0.000000e+00> : vector<128x128xf32>
    %3 = tpu.matmul %1, %2, %cst {dimension_numbers = #tpu.dot_dimension_numbers<[1], [0], [0], [1], [0, 0, 1, 1], [], []>} : vector<128x18xbf16>, vector<18x128xbf16>, vector<128x128xf32> -> vector<128x128xf32>
    %c0_3 = arith.constant 0 : index
    %c0_4 = arith.constant 0 : index
    %4 = vector.load %arg3[%c0_3, %c0_4] : memref<1x128xf32, #tpu.memory_space<vmem>>, vector<1x128xf32>
    %5 = vector.broadcast %4 : vector<1x128xf32> to vector<128x128xf32>
    %6 = arith.addf %3, %5 : vector<128x128xf32>
    %cst_5 = arith.constant 0.000000e+00 : f32
    %7 = vector.broadcast %cst_5 : f32 to vector<128x128xf32>
    %8 = arith.cmpf oge, %6, %7 : vector<128x128xf32>
    %cst_6 = arith.constant 1.000000e-01 : f32
    %9 = vector.broadcast %cst_6 : f32 to vector<128x128xf32>
    %10 = arith.mulf %9, %6 : vector<128x128xf32>
    %11 = arith.select %8, %6, %10 : vector<128x128xi1>, vector<128x128xf32>
    %c0_7 = arith.constant 0 : index
    %c0_8 = arith.constant 0 : index
    %12 = vector.load %arg4[%c0_7, %c0_8] : memref<128x128xf32, #tpu.memory_space<vmem>>, vector<128x128xf32>
    tpu.vector_store %arg4[%c0_7, %c0_8], %11 {strides = array<i32>} : memref<128x128xf32, #tpu.memory_space<vmem>>, vector<128x128xf32>,
    return
  }
  func.func @transform_0(%arg0: i32) -> (i32, i32) {
    %c0_i32 = arith.constant 0 : i32
    %c0_i32_0 = arith.constant 0 : i32
    return %arg0, %c0_i32 : i32, i32
  }
  func.func @transform_1(%arg0: i32) -> (i32, i32) {
    %c0_i32 = arith.constant 0 : i32
    %c0_i32_0 = arith.constant 0 : i32
    %c0_i32_1 = arith.constant 0 : i32
    return %c0_i32, %c0_i32_0 : i32, i32
  }
  func.func @transform_2(%arg0: i32) -> (i32, i32) {
    %c0_i32 = arith.constant 0 : i32
    %c0_i32_0 = arith.constant 0 : i32
    %c0_i32_1 = arith.constant 0 : i32
    return %c0_i32, %c0_i32_0 : i32, i32
  }
  func.func @transform_3(%arg0: i32) -> (i32, i32) {
    %c0_i32 = arith.constant 0 : i32
    %c0_i32_0 = arith.constant 0 : i32
    return %arg0, %c0_i32 : i32, i32
  }
}

</mosaic_0001>

<bundles_post_ra>
// kernel: tpu_custom_call.1
= control target key start
LH: loop header
LB: loop body
LE: loop exit
PB: predicated region body
PF: predicated region fallthrough
CT: control target
= control target key end

     0   :  { %vm81_vm0 = vcmask 1040384   ;;  %s374_s0 = inlined_call_operand.vmem [shape: f32[128,18], index: 0, kind: input, shape index: {}]   ;;  %s375_s1 = inlined_call_operand.vmem [shape: bf16[18,128], index: 1, kind: input, shape index: {}]   ;;  %s376_s2 = inlined_call_operand.vmem [shape: f32[1,128], index: 2, kind: input, shape index: {}]   ;;  %s377_s3 = inlined_call_operand.hbm [shape: f32[128,128], index: 3, kind: output, shape index: {}]  }
   0x1   :  { %v42_v0 = vld [vmem:[%s375_s1 + $0x8] sm:$0x1]  ;;  %v228_v3 = vld [vmem:[%s375_s1] sm:$0xff] }
   0x2   :  { %v52_v1 = vunpack.c.l.b16 %v42_v0  ;;  %v16_v4 = vld [vmem:[%s374_s0] sm:$0xff]  ;;  %v17_v6 = vld [vmem:[%s374_s0 + $0x8] sm:$0xff] }
   0x3   :  { %v20_v7 = vld [vmem:[%s374_s0 + $0x20] sm:$0xff]  ;;  %v21_v8 = vld [vmem:[%s374_s0 + $0x28] sm:$0xff] }
   0x4   :  { %v54_v2 = vpack.c.b16 %v52_v1, %v52_v1  ;;  %v24_v9 = vld [vmem:[%s374_s0 + $0x40] sm:$0xff] }
   0x6   :  { %v83_v5 = vsel %vm81_vm0, %v54_v2, 0 }
   0x7   :  { %91 = vmatpush.bf16.msra.mxu0 %v83_v5  ;;  %229 = vmatpush.bf16.msra.mxu1 %v83_v5 }
   0x8   :  { %8 = vsyncpa [#allocation3], 0  ;;  %230 = vmatpush.bf16.msra.mxu2 %v83_v5  ;;  %231 = vmatpush.bf16.msra.mxu3 %v83_v5  ;;  %v25_v10 = vld [vmem:[%s374_s0 + $0x48] sm:$0xff]  ;;  %v28_v11 = vld [vmem:[%s374_s0 + $0x60] sm:$0xff]  ;;  %v32_v13 = vpack.c.bf16 %v17_v6, %v16_v4  ;;  %v34_v14 = vpack.c.bf16 %v21_v8, %v20_v7  ;;  %vm56_vm1 = vcmask 146432   ;;  %s204_s1 = sshll.u32 %s377_s3, 4  ;;  %s205_s1 = int_to_ptr.hbm [resolvable:$true] %s204_s1 }
   0x9   :  { %v29_v12 = vld [vmem:[%s374_s0 + $0x68] sm:$0xff]  ;;  %v36_v15 = vpack.c.bf16 %v25_v10, %v24_v9  ;;  %v18_v17 = vld [vmem:[%s374_s0 + $0x10] sm:$0xff]  ;;  %v19_v18 = vld [vmem:[%s374_s0 + $0x18] sm:$0xff]  ;;  %s266_s24 = smov 128   ;;  %s267_s25 = smov 8  }
   0xa   :  { %v38_v16 = vpack.c.bf16 %v29_v12, %v28_v11  ;;  %v22_v19 = vld [vmem:[%s374_s0 + $0x30] sm:$0xff]  ;;  %v23_v20 = vld [vmem:[%s374_s0 + $0x38] sm:$0xff]  ;;  %v33_v25 = vpack.c.bf16 %v19_v18, %v18_v17  ;;  %v353_v29 = vld [vmem:[%s376_s2] ss:$0 sm:$0xff] }
   0xb   :  { %92 = vmatpush.bf16.msra.mxu0 %v228_v3  ;;  %232 = vmatpush.bf16.msra.mxu1 %v228_v3  ;;  %v26_v21 = vld [vmem:[%s374_s0 + $0x50] sm:$0xff]  ;;  %v27_v22 = vld [vmem:[%s374_s0 + $0x58] sm:$0xff]  ;;  %v35_v26 = vpack.c.bf16 %v23_v20, %v22_v19 }
   0xc   :  { %233 = vmatpush.bf16.msra.mxu2 %v228_v3  ;;  %234 = vmatpush.bf16.msra.mxu3 %v228_v3  ;;  %v30_v23 = vld [vmem:[%s374_s0 + $0x70] sm:$0xff]  ;;  %v31_v24 = vld [vmem:[%s374_s0 + $0x78] sm:$0xff]  ;;  %v37_v27 = vpack.c.bf16 %v27_v22, %v26_v21  ;;  %s265_s0 = smov [#allocation2]  }
   0xd   :  { %v39_v28 = vpack.c.bf16 %v31_v24, %v30_v23  ;;  %s202_s2 = sshll.u32 %s265_s0, 4  ;;  %s203_s2 = int_to_ptr.vmem [resolvable:$true] %s202_s2 }
   0xe   :  { %220 = vmatmul.msk.bf16.vlgmr.msra.gmra.mxu0 %vm56_vm1, %v32_v13  ;;  %222 = vmatmul.msk.bf16.vlgmr.msra.gmra.mxu1 %vm56_vm1, %v34_v14 }
   0xf   :  { %224 = vmatmul.msk.bf16.vlgmr.msra.gmra.mxu2 %vm56_vm1, %v36_v15  ;;  %226 = vmatmul.msk.bf16.vlgmr.msra.gmra.mxu3 %vm56_vm1, %v38_v16 }
  0x1e   :  { %221 = vmatmul.msk.bf16.gmra.mxu0 %vm56_vm1, %v33_v25  ;;  %223 = vmatmul.msk.bf16.gmra.mxu1 %vm56_vm1, %v35_v26 }
  0x1f   :  { %225 = vmatmul.msk.bf16.gmra.mxu2 %vm56_vm1, %v37_v27  ;;  %227 = vmatmul.msk.bf16.gmra.mxu3 %vm56_vm1, %v39_v28 }
  0x8b   :  { %v94_v30 = vpop.f32.mrf.mxu0  ;;  %v104_v31 = vpop.f32.mrf.mxu1 }
  0x8c   :  { %v95_v32 = vadd.f32 %v353_v29, %v94_v30  ;;  %v105_v33 = vadd.f32 %v353_v29, %v104_v31 }
  0x8e   :  { %vm134_vm2 = vcmp.ge.f32.partialorder %v95_v32, 0.0  ;;  %v150_v34 = vmul.f32 0.1, %v95_v32  ;;  %vm138_vm3 = vcmp.ge.f32.partialorder %v105_v33, 0.0  ;;  %v154_v35 = vmul.f32 0.1, %v105_v33 }
  0x90   :  { %v166_v36 = vsel %vm134_vm2, %v95_v32, %v150_v34  ;;  %v170_v37 = vsel %vm138_vm3, %v105_v33, %v154_v35 }
  0x91   :  { %182 = vst [vmem:[#allocation2] sm:$0xff] %v166_v36 }
  0x92   :  { %186 = vst [vmem:[#allocation2 + $0x20] sm:$0xff] %v170_v37  ;;  %v114_v38 = vpop.f32.mrf.mxu2  ;;  %v124_v39 = vpop.f32.mrf.mxu3 }
  0x93   :  { %v115_v40 = vadd.f32 %v353_v29, %v114_v38  ;;  %v125_v41 = vadd.f32 %v353_v29, %v124_v39  ;;  %v96_v42 = vpop.f32.mrf.mxu0  ;;  %v106_v43 = vpop.f32.mrf.mxu1 }
  0x94   :  { %v97_v44 = vadd.f32 %v353_v29, %v96_v42  ;;  %v107_v45 = vadd.f32 %v353_v29, %v106_v43 }
  0x95   :  { %vm142_vm4 = vcmp.ge.f32.partialorder %v115_v40, 0.0  ;;  %v158_v46 = vmul.f32 0.1, %v115_v40  ;;  %vm146_vm5 = vcmp.ge.f32.partialorder %v125_v41, 0.0  ;;  %v162_v47 = vmul.f32 0.1, %v125_v41 }
  0x96   :  { %vm135_vm6 = vcmp.ge.f32.partialorder %v97_v44, 0.0  ;;  %v151_v48 = vmul.f32 0.1, %v97_v44  ;;  %vm139_vm7 = vcmp.ge.f32.partialorder %v107_v45, 0.0  ;;  %v155_v49 = vmul.f32 0.1, %v107_v45 }
  0x97   :  { %v174_v50 = vsel %vm142_vm4, %v115_v40, %v158_v46  ;;  %v178_v51 = vsel %vm146_vm5, %v125_v41, %v162_v47 }
  0x98   :  { %190 = vst [vmem:[#allocation2 + $0x40] sm:$0xff] %v174_v50  ;;  %v167_v52 = vsel %vm135_vm6, %v97_v44, %v151_v48  ;;  %v171_v53 = vsel %vm139_vm7, %v107_v45, %v155_v49 }
  0x99   :  { %194 = vst [vmem:[#allocation2 + $0x60] sm:$0xff] %v178_v51 }
  0x9a   :  { %183 = vst [vmem:[#allocation2 + $0x8] sm:$0xff] %v167_v52  ;;  %v116_v54 = vpop.f32.mrf.mxu2  ;;  %v126_v55 = vpop.f32.mrf.mxu3 }
  0x9b   :  { %187 = vst [vmem:[#allocation2 + $0x28] sm:$0xff] %v171_v53  ;;  %v117_v56 = vadd.f32 %v353_v29, %v116_v54  ;;  %v127_v57 = vadd.f32 %v353_v29, %v126_v55  ;;  %v99_v58 = vpop.f32.mrf.mxu0  ;;  %v109_v59 = vpop.f32.mrf.mxu1 }
  0x9c   :  { %v100_v60 = vadd.f32 %v353_v29, %v99_v58  ;;  %v110_v61 = vadd.f32 %v353_v29, %v109_v59 }
  0x9d   :  { %vm143_vm8 = vcmp.ge.f32.partialorder %v117_v56, 0.0  ;;  %v159_v62 = vmul.f32 0.1, %v117_v56  ;;  %vm147_vm9 = vcmp.ge.f32.partialorder %v127_v57, 0.0  ;;  %v163_v63 = vmul.f32 0.1, %v127_v57 }
  0x9e   :  { %vm136_vm10 = vcmp.ge.f32.partialorder %v100_v60, 0.0  ;;  %v152_v0 = vmul.f32 0.1, %v100_v60  ;;  %vm140_vm11 = vcmp.ge.f32.partialorder %v110_v61, 0.0  ;;  %v156_v1 = vmul.f32 0.1, %v110_v61 }
  0x9f   :  { %v175_v2 = vsel %vm143_vm8, %v117_v56, %v159_v62  ;;  %v179_v3 = vsel %vm147_vm9, %v127_v57, %v163_v63 }
  0xa0   :  { %191 = vst [vmem:[#allocation2 + $0x48] sm:$0xff] %v175_v2  ;;  %v168_v4 = vsel %vm136_vm10, %v100_v60, %v152_v0  ;;  %v172_v5 = vsel %vm140_vm11, %v110_v61, %v156_v1 }
  0xa1   :  { %195 = vst [vmem:[#allocation2 + $0x68] sm:$0xff] %v179_v3 }
  0xa2   :  { %184 = vst [vmem:[#allocation2 + $0x10] sm:$0xff] %v168_v4  ;;  %v119_v6 = vpop.f32.mrf.mxu2  ;;  %v129_v7 = vpop.f32.mrf.mxu3 }
  0xa3   :  { %188 = vst [vmem:[#allocation2 + $0x30] sm:$0xff] %v172_v5  ;;  %v120_v8 = vadd.f32 %v353_v29, %v119_v6  ;;  %v130_v9 = vadd.f32 %v353_v29, %v129_v7  ;;  %v101_v10 = vpop.f32.mrf.mxu0  ;;  %v111_v11 = vpop.f32.mrf.mxu1 }
  0xa4   :  { %v102_v12 = vadd.f32 %v353_v29, %v101_v10  ;;  %v112_v13 = vadd.f32 %v353_v29, %v111_v11 }
  0xa5   :  { %vm144_vm12 = vcmp.ge.f32.partialorder %v120_v8, 0.0  ;;  %v160_v14 = vmul.f32 0.1, %v120_v8  ;;  %vm148_vm13 = vcmp.ge.f32.partialorder %v130_v9, 0.0  ;;  %v164_v15 = vmul.f32 0.1, %v130_v9 }
  0xa6   :  { %vm137_vm14 = vcmp.ge.f32.partialorder %v102_v12, 0.0  ;;  %v153_v16 = vmul.f32 0.1, %v102_v12  ;;  %vm141_vm15 = vcmp.ge.f32.partialorder %v112_v13, 0.0  ;;  %v157_v17 = vmul.f32 0.1, %v112_v13 }
  0xa7   :  { %v176_v18 = vsel %vm144_vm12, %v120_v8, %v160_v14  ;;  %v180_v19 = vsel %vm148_vm13, %v130_v9, %v164_v15 }
  0xa8   :  { %192 = vst [vmem:[#allocation2 + $0x50] sm:$0xff] %v176_v18  ;;  %v169_v20 = vsel %vm137_vm14, %v102_v12, %v153_v16  ;;  %v173_v21 = vsel %vm141_vm15, %v112_v13, %v157_v17 }
  0xa9   :  { %196 = vst [vmem:[#allocation2 + $0x70] sm:$0xff] %v180_v19 }
  0xaa   :  { %185 = vst [vmem:[#allocation2 + $0x18] sm:$0xff] %v169_v20  ;;  %v121_v22 = vpop.f32.mrf.mxu2  ;;  %v131_v23 = vpop.f32.mrf.mxu3 }
  0xab   :  { %189 = vst [vmem:[#allocation2 + $0x38] sm:$0xff] %v173_v21  ;;  %v122_v24 = vadd.f32 %v353_v29, %v121_v22  ;;  %v132_v25 = vadd.f32 %v353_v29, %v131_v23 }
  0xad   :  { %vm145_vm0 = vcmp.ge.f32.partialorder %v122_v24, 0.0  ;;  %v161_v26 = vmul.f32 0.1, %v122_v24  ;;  %vm149_vm1 = vcmp.ge.f32.partialorder %v132_v25, 0.0  ;;  %v165_v27 = vmul.f32 0.1, %v132_v25 }
  0xaf   :  { %v177_v28 = vsel %vm145_vm0, %v122_v24, %v161_v26  ;;  %v181_v30 = vsel %vm149_vm1, %v132_v25, %v165_v27 }
  0xb0   :  { %193 = vst [vmem:[#allocation2 + $0x58] sm:$0xff] %v177_v28 }
  0xb1   :  { %197 = vst [vmem:[#allocation2 + $0x78] sm:$0xff] %v181_v30 }
  0xb2   :  { %210 = dma.vmem_to_hbm [thread:$0]  %s203_s2, 2048, %s205_s1, [#allocation3], %s266_s24, %s266_s24, %s267_s25  }
  0xb3   :  { %263 = dma.done.wait [#allocation3], 2048  }
  0xb4   :  { %264 = vsyncadd [#allocation3], 4294965248 }
  0xb5   :  { %215 = vsyncpa [#allocation3], 1 }

</bundles_post_ra>
